<compile_context>
chip_gen: v7x
topology: tpu7x:2x2x1
jax: 0.10.0
libtpu: 0.0.40
codegen_flags: <defaults>
</compile_context>

<pallas_src>
import functools

import jax
import jax.numpy as jnp
from jax import lax
from jax.experimental import pallas as pl
from jax.experimental.pallas import tpu as pltpu


def _mean_pool_kernel(x_ref, valid_ref, out_ref, cnt_ref, *, slab, unroll):
    # x_ref:     (ts, tb, th)  input dtype (bf16/f32)
    # valid_ref: (ts, tb, 1)   f32, 1.0 where the token is NOT padding
    # out_ref:   (tb, th)      f32, resident across the S grid axis (accumulator)
    # cnt_ref:   (tb, 1)       f32 scratch (running valid-token count)
    s = pl.program_id(2)

    @pl.when(s == 0)
    def _init():
        out_ref[...] = jnp.zeros_like(out_ref)
        cnt_ref[...] = jnp.zeros_like(cnt_ref)

    ts = x_ref.shape[0]
    n_slabs = ts // slab

    def body(i, carry):
        off = pl.multiple_of(i * slab, slab)
        xs = x_ref[pl.ds(off, slab), :, :].astype(jnp.float32)   # (slab, tb, th)
        vs = valid_ref[pl.ds(off, slab), :, :]                   # (slab, tb, 1)
        out_ref[...] += jnp.sum(xs * vs, axis=0)                 # (tb, th)
        cnt_ref[...] += jnp.sum(vs, axis=0)                      # (tb, 1)
        return carry

    lax.fori_loop(0, n_slabs, body, 0, unroll=unroll)

    @pl.when(s == pl.num_programs(2) - 1)
    def _finalize():
        # Exact 1/count; zero valid tokens -> inf -> NaN (matches PyTorch 0/0).
        out_ref[...] = out_ref[...] * pl.reciprocal(cnt_ref[...], approx=False)


def _largest_divisor_at_most(n, cap):
    cap = max(1, min(n, cap))
    for t in range(cap, 0, -1):
        if n % t == 0:
            return t
    return 1


def mean_pooler(x, padding_mask, *, max_s_tile=None, per_buffer_bytes=4 * 1024 * 1024):
    """x: (S, B, H) float (bf16/f32); padding_mask: (S, B) bool (True = pad).

    Returns (B, H) float32: mean of x over non-pad positions along the S axis.
    """
    S, B, H = x.shape
    x_bytes = jnp.dtype(x.dtype).itemsize

    # --- batch tile: full sublane groups (multiple of 8) or the whole dim. ---
    tb = 8 if B % 8 == 0 else B

    # --- hidden tile: as large as possible (full H) for long contiguous DMA rows. ---
    th = H
    if H % 128 == 0:
        # Keep a single S-row of the x block within the per-buffer budget.
        while tb * th * x_bytes > per_buffer_bytes and th % 256 == 0:
            th //= 2

    # --- guarantee combined parallel-axis extent >= 2 for v7x megacore sharding. ---
    if (B // tb) * (H // th) == 1:
        if H % 256 == 0:
            th = H // 2
        elif B % 16 == 0:
            tb = B // 2

    # --- sequence tile from a byte budget: x row + padded (tb,1) mask row, x2 buffers. ---
    mask_row_bytes = ((tb + 7) // 8) * 8 * 128 * 4          # (tb,1) pads to (8,128) f32
    row_bytes = tb * th * x_bytes + mask_row_bytes
    ts_cap = max(1, per_buffer_bytes // row_bytes)
    if max_s_tile is not None:
        ts_cap = min(ts_cap, max_s_tile)
    ts_cap = min(ts_cap, S)

    ts = _largest_divisor_at_most(S, ts_cap)
    s_pad = S
    if ts * 2 < ts_cap:
        # Only tiny divisors exist (awkward/prime S): pad S on the host instead of
        # paying a >10x per-step-overhead cliff.  Padded rows are masked out exactly.
        n_steps = -(-S // ts_cap)                      # ceil
        ts = -(-S // n_steps)                          # ceil(S / n_steps)
        ts = min(ts_cap, ((ts + 7) // 8) * 8)
        s_pad = n_steps * ts

    # Tiny side input: 1.0 where the token is valid.  (S, B, 1) keeps B on sublanes.
    valid = jnp.logical_not(padding_mask).astype(jnp.float32)[:, :, None]
    if s_pad != S:
        x = jnp.pad(x, ((0, s_pad - S), (0, 0), (0, 0)))        # zeros -> contribute 0
        valid = jnp.pad(valid, ((0, s_pad - S), (0, 0), (0, 0)))  # zeros -> "padding"

    grid = (B // tb, H // th, s_pad // ts)

    # Slab size bounds the in-kernel f32 upcast temporaries to ~1 MiB.
    slab_rows = max(1, (1024 * 1024) // (tb * th * 4))
    slab = _largest_divisor_at_most(ts, min(ts, slab_rows))
    n_slabs = ts // slab
    unroll = True if n_slabs <= 8 else 8

    kernel = functools.partial(_mean_pool_kernel, slab=slab, unroll=unroll)

    return pl.pallas_call(
        kernel,
        out_shape=jax.ShapeDtypeStruct((B, H), jnp.float32),
        grid_spec=pltpu.PrefetchScalarGridSpec(
            num_scalar_prefetch=0,
            grid=grid,
            in_specs=[
                pl.BlockSpec((ts, tb, th), lambda b, h, s: (s, b, h)),
                pl.BlockSpec((ts, tb, 1), lambda b, h, s: (s, b, 0)),
            ],
            # Same block index across the S axis -> output stays resident (accumulator).
            out_specs=pl.BlockSpec((tb, th), lambda b, h, s: (b, h)),
            scratch_shapes=[pltpu.VMEM((tb, 1), jnp.float32)],   # running valid count
        ),
        compiler_params=pltpu.CompilerParams(
            dimension_semantics=("parallel", "parallel", "arbitrary"),
            vmem_limit_bytes=32 * 1024 * 1024,
        ),
    )(x, valid)


if __name__ == "__main__":
    key = jax.random.PRNGKey(0)
    S, B, H = 64, 8, 256   # small, vreg-aligned (B mult of 8, H mult of 128)

    # bf16 activations (native-dtype DMA path); kernel accumulates in f32.
    x = jax.random.normal(key, (S, B, H), dtype=jnp.float32).astype(jnp.bfloat16)

    # Per-batch valid lengths; pad tokens fill the tail (>=1 valid to avoid 0/0).
    lengths = jnp.array([64, 48, 33, 17, 9, 5, 2, 1], dtype=jnp.int32)
    pos = jnp.arange(S)[:, None]                  # (S, 1)
    padding_mask = pos >= lengths[None, :]        # (S, B) bool, True where pad

    # max_s_tile=16 -> grid (1, 2, 4): exercises init / accumulate / finalize and
    # multiple (megacore-shardable) output blocks.
    out = mean_pooler(x, padding_mask, max_s_tile=16)
    jax.block_until_ready(out)

    # Pure-JAX reference (mirrors the PyTorch forward) on the same bf16 input.
    xf = x.astype(jnp.float32)
    valid = (~padding_mask)[:, :, None].astype(jnp.float32)
    ref = (xf * valid).sum(0) / valid.sum(0)

    assert out.shape == (B, H)
    assert jnp.allclose(out, ref, atol=1e-5, rtol=1e-5), "Pallas kernel mismatch vs reference"

    print("KERNEL_OK")
</pallas_src>

<mosaic_0001>
module attributes {stable_mosaic.version = 11 : i64} {
  func.func @_mean_pool_kernel(%arg0: i32, %arg1: i32, %arg2: i32, %arg3: memref<16x8x128xbf16, #tpu.memory_space<vmem>>, %arg4: memref<16x8x1xf32, #tpu.memory_space<vmem>>, %arg5: memref<8x128xf32, #tpu.memory_space<vmem>>, %arg6: memref<8x1xf32, #tpu.memory_space<vmem>>) attributes {dimension_semantics = [#tpu.dimension_semantics<parallel>, #tpu.dimension_semantics<parallel>, #tpu.dimension_semantics<arbitrary>], iteration_bounds = array<i64: 1, 2, 4>, scalar_prefetch = 0 : i64, scratch_operands = 1 : i64, tpu.core_type = #tpu.core_type<tc>, window_params = [{transform_indices = @transform_0, window_bounds = array<i64: 16, 8, 128>}, {transform_indices = @transform_1, window_bounds = array<i64: 16, 8, 1>}, {transform_indices = @transform_2, window_bounds = array<i64: 8, 128>}]} {
    %c0_i32 = arith.constant 0 : i32
    %0 = arith.cmpi eq, %arg2, %c0_i32 : i32
    %1 = arith.extui %0 : i1 to i32
    %c0_i32_0 = arith.constant 0 : i32
    %2 = arith.cmpi ne, %1, %c0_i32_0 : i32
    scf.if %2 {
      %cst_15 = arith.constant 0.000000e+00 : f32
      %23 = vector.broadcast %cst_15 : f32 to vector<8x128xf32>
      %c0_16 = arith.constant 0 : index
      %c0_17 = arith.constant 0 : index
      %24 = vector.load %arg5[%c0_16, %c0_17] : memref<8x128xf32, #tpu.memory_space<vmem>>, vector<8x128xf32>
      tpu.vector_store %arg5[%c0_16, %c0_17], %23 {strides = array<i32>} : memref<8x128xf32, #tpu.memory_space<vmem>>, vector<8x128xf32>,
      %cst_18 = arith.constant 0.000000e+00 : f32
      %25 = vector.broadcast %cst_18 : f32 to vector<8x1xf32>
      %c0_19 = arith.constant 0 : index
      %c0_20 = arith.constant 0 : index
      %26 = vector.load %arg6[%c0_19, %c0_20] : memref<8x1xf32, #tpu.memory_space<vmem>>, vector<8x1xf32>
      tpu.vector_store %arg6[%c0_19, %c0_20], %25 {strides = array<i32>} : memref<8x1xf32, #tpu.memory_space<vmem>>, vector<8x1xf32>,
    } else {
    }
    %c0_i32_1 = arith.constant 0 : i32
    %c16_i32 = arith.constant 16 : i32
    %3 = arith.muli %c0_i32_1, %c16_i32 : i32
    %4 = tpu.assume_multiple %3, 16 : i32
    %5 = arith.index_cast %4 : i32 to index
    %c0 = arith.constant 0 : index
    %c0_2 = arith.constant 0 : index
    %6 = vector.load %arg3[%5, %c0, %c0_2] : memref<16x8x128xbf16, #tpu.memory_space<vmem>>, vector<16x8x128xbf16>
    %7 = arith.extf %6 : vector<16x8x128xbf16> to vector<16x8x128xf32>
    %8 = arith.index_cast %4 : i32 to index
    %c0_3 = arith.constant 0 : index
    %c0_4 = arith.constant 0 : index
    %9 = vector.load %arg4[%8, %c0_3, %c0_4] : memref<16x8x1xf32, #tpu.memory_space<vmem>>, vector<16x8x1xf32>
    %c0_5 = arith.constant 0 : index
    %c0_6 = arith.constant 0 : index
    %10 = vector.load %arg5[%c0_5, %c0_6] : memref<8x128xf32, #tpu.memory_space<vmem>>, vector<8x128xf32>
    %11 = vector.broadcast %9 : vector<16x8x1xf32> to vector<16x8x128xf32>
    %12 = arith.mulf %7, %11 : vector<16x8x128xf32>
    %cst = arith.constant dense<0.000000e+00> : vector<8x128xf32>
    %13 = vector.multi_reduction <add>, %12, %cst [0] : vector<16x8x128xf32> to vector<8x128xf32>
    %14 = arith.addf %10, %13 : vector<8x128xf32>
    %c0_7 = arith.constant 0 : index
    %c0_8 = arith.constant 0 : index
    %15 = vector.load %arg5[%c0_7, %c0_8] : memref<8x128xf32, #tpu.memory_space<vmem>>, vector<8x128xf32>
    tpu.vector_store %arg5[%c0_7, %c0_8], %14 {strides = array<i32>} : memref<8x128xf32, #tpu.memory_space<vmem>>, vector<8x128xf32>,
    %c0_9 = arith.constant 0 : index
    %c0_10 = arith.constant 0 : index
    %16 = vector.load %arg6[%c0_9, %c0_10] : memref<8x1xf32, #tpu.memory_space<vmem>>, vector<8x1xf32>
    %cst_11 = arith.constant dense<0.000000e+00> : vector<8x1xf32>
    %17 = vector.multi_reduction <add>, %9, %cst_11 [0] : vector<16x8x1xf32> to vector<8x1xf32>
    %18 = arith.addf %16, %17 : vector<8x1xf32>
    %c0_12 = arith.constant 0 : index
    %c0_13 = arith.constant 0 : index
    %19 = vector.load %arg6[%c0_12, %c0_13] : memref<8x1xf32, #tpu.memory_space<vmem>>, vector<8x1xf32>
    tpu.vector_store %arg6[%c0_12, %c0_13], %18 {strides = array<i32>} : memref<8x1xf32, #tpu.memory_space<vmem>>, vector<8x1xf32>,
    %c1_i32 = arith.constant 1 : i32
    %c3_i32 = arith.constant 3 : i32
    %20 = arith.cmpi eq, %arg2, %c3_i32 : i32
    %21 = arith.extui %20 : i1 to i32
    %c0_i32_14 = arith.constant 0 : i32
    %22 = arith.cmpi ne, %21, %c0_i32_14 : i32
    scf.if %22 {
      %c0_15 = arith.constant 0 : index
      %c0_16 = arith.constant 0 : index
      %23 = vector.load %arg5[%c0_15, %c0_16] : memref<8x128xf32, #tpu.memory_space<vmem>>, vector<8x128xf32>
      %c0_17 = arith.constant 0 : index
      %c0_18 = arith.constant 0 : index
      %24 = vector.load %arg6[%c0_17, %c0_18] : memref<8x1xf32, #tpu.memory_space<vmem>>, vector<8x1xf32>
      %25 = tpu.reciprocal %24 : vector<8x1xf32> -> vector<8x1xf32>
      %26 = vector.broadcast %25 : vector<8x1xf32> to vector<8x128xf32>
      %27 = arith.mulf %23, %26 : vector<8x128xf32>
      %c0_19 = arith.constant 0 : index
      %c0_20 = arith.constant 0 : index
      %28 = vector.load %arg5[%c0_19, %c0_20] : memref<8x128xf32, #tpu.memory_space<vmem>>, vector<8x128xf32>
      tpu.vector_store %arg5[%c0_19, %c0_20], %27 {strides = array<i32>} : memref<8x128xf32, #tpu.memory_space<vmem>>, vector<8x128xf32>,
    } else {
    }
    return
  }
  func.func @transform_0(%arg0: i32, %arg1: i32, %arg2: i32) -> (i32, i32, i32) {
    %c0_i32 = arith.constant 0 : i32
    return %arg2, %arg0, %arg1 : i32, i32, i32
  }
  func.func @transform_1(%arg0: i32, %arg1: i32, %arg2: i32) -> (i32, i32, i32) {
    %c0_i32 = arith.constant 0 : i32
    %c0_i32_0 = arith.constant 0 : i32
    return %arg2, %arg0, %c0_i32 : i32, i32, i32
  }
  func.func @transform_2(%arg0: i32, %arg1: i32, %arg2: i32) -> (i32, i32) {
    %c0_i32 = arith.constant 0 : i32
    return %arg0, %arg1 : i32, i32
  }
}

</mosaic_0001>

<bundles_post_ra>
// kernel: tpu_custom_call.1
= control target key start
LH: loop header
LB: loop body
LE: loop exit
PB: predicated region body
PF: predicated region fallthrough
CT: control target
= control target key end

     0   :  { %7 = vsyncpa [#allocation5], 0  ;;  %s1169_s0 = inlined_call_operand.vmem [shape: bf16[64,8,256], index: 0, kind: input, shape index: {}]   ;;  %s1170_s1 = inlined_call_operand.vmem [shape: f32[64,8,1], index: 1, kind: input, shape index: {}]   ;;  %s1171_s2 = inlined_call_operand.hbm [shape: f32[8,256], index: 2, kind: output, shape index: {}]  }
   0x1   :  { %9 = vsyncpa [#allocation5 + $0x1], 0  ;;  %s928_s9 = smov 0   ;;  %s930_s10 = smov 0  }
   0x2   :  { %s932_s11 = smov 0   ;;  %s934_s12 = smov 0  }
   0x3   :  { %s936_s13 = smov 0   ;;  %s938_s14 = smov 0  }
   0x4   :  { %s940_s15 = smov 0   ;;  %s942_s16 = smov 0  }
   0x5   :  { %s944_s17 = smov 0   ;;  %s946_s18 = smov 0  }
   0x6 LB: > { %s643_s19 = sadd.s32 4294967295, %s907_s18   ;;  %s644_s20 = sadd.s32 4294967294, %s907_s18   ;;  %s907_s18 = sphi %s946_s18, %s15_s18   ;;  %s903_s17 = sphi %s944_s17, %s1183_s17   ;;  %s899_s16 = sphi %s942_s16, %s1182_s16   ;;  %s895_s15 = sphi %s940_s15, %s1181_s15   ;;  %s891_s14 = sphi %s938_s14, %s1180_s14   ;;  %s887_s13 = sphi %s936_s13, %s1179_s13   ;;  %s883_s12 = sphi %s934_s12, %s1178_s12   ;;  %s879_s11 = sphi %s932_s11, %s1177_s11   ;;  %s875_s10 = sphi %s930_s10, %s1176_s10   ;;  %s871_s9 = sphi %s928_s9, %s1175_s9  }
   0x7   : > { %s27_s21 = sadd.s32 1, %s899_s16  ;;  %s30_s22 = sadd.s32 1, %s903_s17 }
   0x8   : > { %p28_p0 = scmp.ge.s32.totalorder %s27_s21, 4  ;;  %s45_s23 = sadd.s32 1, %s887_s13 }
   0x9   : > { %p52_p1 = scmp.ne.s32.totalorder %s887_s13, %s883_s12  ;;  %p53_p2 = scmp.eq.s32.totalorder %s907_s18, 0 }
   0xa   : > { %s1185_s21 = smov (%p28_p0, %s27_s21), 0  ;;  %s1187_s22 = smov (!%p28_p0, %s30_s22), %s903_s17 }
   0xb   : > { %s38_s24 = ssub.s32 %s899_s16, %s1185_s21  ;;  %p991_p3 = por %p53_p2, %p52_p1 }
   0xc   : > { %p32_p4 = scmp.ge.s32.totalorder %s1187_s22, 2  ;;  %s101_s26 = sadd.s32 1, %s879_s11 }
   0xd   : > { %p111_p5 = scmp.ne.s32.totalorder %s879_s11, %s875_s10  ;;  %p112_p6 = scmp.eq.s32.totalorder %s643_s19, 7 }
   0xe   : > { %s1189_s22 = smov (%p32_p4, %s1187_s22), 0  ;;  %p117_p8 = scmp.ne.s32.totalorder %s875_s10, %s871_s9 }
   0xf   : > { %p1000_p7 = por %p112_p6, %p111_p5  ;;  %s41_s28 = ssub.s32 %s903_s17, %s1189_s22 }
  0x10   : > { %p118_p9 = scmp.eq.s32.totalorder %s644_s20, 7  ;;  %s42_s29 = sor.u32 %s41_s28, %s38_s24 }
  0x11   : > { %p99_p10 = scmp.eq.s32.totalorder %s41_s28, 0  ;;  %p43_p11 = scmp.eq.s32.totalorder %s42_s29, 0 }
  0x12   : > { %p1008_p12 = por %p118_p9, %p117_p8  ;;  %p646_p13 = scmp.ge.s32.totalorder %s907_s18, 8 }
  0x13   : > { %s1013_s3 = scalar_select %p99_p10, %s879_s11, %s101_s26  }
  0x14   : > { %s1016_s4 = scalar_select %p43_p11, %s887_s13, %s45_s23  }
  0x15   : > { %134 = sbr.rel (%p646_p13) target bundleno = 44 (0x2c), region = 16 }
  0x1c   : > { %137 = sbr.rel (!%p991_p3) target bundleno = 44 (0x2c), region = 20  ;;  %s139_s5 = sand.u32 (%p991_p3), 1, %s887_s13  }
  0x1d   : > { %s662_s6 = sshll.u32 (%p991_p3), %s899_s16, 5  ;;  %s647_s7 = sshll.u32 (%p991_p3), %s139_s5, 6 }
  0x1e   : > { %s146_s8 = sadd.s32 (%p991_p3), %s903_s17, %s662_s6  ;;  %s141_s23 = scalar_lea.vmem (%p991_p3), [#allocation3], %s647_s7 }
  0x1f   : > { %s650_s19 = sshll.u32 (%p991_p3), %s146_s8, 2 }
  0x20   : > { %s1027_s26 = scalar_lea.vmem (%p991_p3), %s1169_s0, %s650_s19 }
  0x21   : > { %v164_v0 = vld [vmem:[%s1027_s26] sm:$0xf] (%p991_p3)  ;;  %v166_v1 = vld [vmem:[%s1027_s26 + $0x8] sm:$0xf] (%p991_p3)  ;;  %v168_v2 = vld [vmem:[%s1027_s26 + $0x10] sm:$0xf] (%p991_p3) }
  0x22   : > { %165 = vst [vmem:[%s141_s23] sm:$0xf] (%p991_p3), %v164_v0  ;;  %167 = vst [vmem:[%s141_s23 + $0x4] sm:$0xf] (%p991_p3), %v166_v1  ;;  %v170_v3 = vld [vmem:[%s1027_s26 + $0x18] sm:$0xf] (%p991_p3) }
  0x23   : > { %169 = vst [vmem:[%s141_s23 + $0x8] sm:$0xf] %v168_v2  ;;  %v172_v4 = vld [vmem:[%s1027_s26 + $0x20] sm:$0xf]  ;;  %v174_v5 = vld [vmem:[%s1027_s26 + $0x28] sm:$0xf] }
  0x24   : > { %171 = vst [vmem:[%s141_s23 + $0xc] sm:$0xf] %v170_v3  ;;  %173 = vst [vmem:[%s141_s23 + $0x10] sm:$0xf] %v172_v4  ;;  %v176_v6 = vld [vmem:[%s1027_s26 + $0x30] sm:$0xf] }
  0x25   : > { %175 = vst [vmem:[%s141_s23 + $0x14] sm:$0xf] %v174_v5  ;;  %v178_v7 = vld [vmem:[%s1027_s26 + $0x38] sm:$0xf]  ;;  %v180_v8 = vld [vmem:[%s1027_s26 + $0x40] sm:$0xf] }
  0x26   : > { %177 = vst [vmem:[%s141_s23 + $0x18] sm:$0xf] %v176_v6  ;;  %179 = vst [vmem:[%s141_s23 + $0x1c] sm:$0xf] %v178_v7  ;;  %v182_v9 = vld [vmem:[%s1027_s26 + $0x48] sm:$0xf] }
  0x27   : > { %181 = vst [vmem:[%s141_s23 + $0x20] sm:$0xf] %v180_v8  ;;  %v184_v10 = vld [vmem:[%s1027_s26 + $0x50] sm:$0xf]  ;;  %v186_v11 = vld [vmem:[%s1027_s26 + $0x58] sm:$0xf] }
  0x28   : > { %183 = vst [vmem:[%s141_s23 + $0x24] sm:$0xf] %v182_v9  ;;  %185 = vst [vmem:[%s141_s23 + $0x28] sm:$0xf] %v184_v10  ;;  %v188_v12 = vld [vmem:[%s1027_s26 + $0x60] sm:$0xf] }
  0x29   : > { %187 = vst [vmem:[%s141_s23 + $0x2c] sm:$0xf] %v186_v11  ;;  %v190_v13 = vld [vmem:[%s1027_s26 + $0x68] sm:$0xf]  ;;  %v192_v14 = vld [vmem:[%s1027_s26 + $0x70] sm:$0xf] }
  0x2a   : > { %189 = vst [vmem:[%s141_s23 + $0x30] sm:$0xf] %v188_v12  ;;  %191 = vst [vmem:[%s141_s23 + $0x34] sm:$0xf] %v190_v13  ;;  %v194_v15 = vld [vmem:[%s1027_s26 + $0x78] sm:$0xf] }
  0x2b   : > { %193 = vst [vmem:[%s141_s23 + $0x38] sm:$0xf] %v192_v14  ;;  %195 = vst [vmem:[%s141_s23 + $0x3c] sm:$0xf] %v194_v15 }
  0x2c PF: > { %p651_p0 = scmp.ge.s32.totalorder %s907_s18, 1  ;;  %p261_p1 = scmp.lt.s32.totalorder %s907_s18, 9 }
  0x2e   : > { %p262_p2 = pnand %p651_p0, %p261_p1 }
  0x2f   : > { %s268_s25 = sand.u32 (!%p262_p2), 1, %s883_s12   ;;  %s294_s28 = sand.u32 (!%p262_p2), 1, %s875_s10  }
  0x30   : > { %265 = sbr.rel (%p262_p2) target bundleno = 355 (0x163), region = 65  ;;  %s652_s29 = sshll.u32 (!%p262_p2), %s268_s25, 6 }
  0x31   : > { %s653_s5 = sshll.u32 (!%p262_p2), %s294_s28, 3  ;;  %s654_s6 = sshll.u32 (!%p262_p2), %s891_s14, 4 }
  0x32   : > { %p299_p3 = scmp.lt.s32.totalorder (!%p262_p2), %s654_s6, 63  ;;  %s1057_s24 = scalar_lea.vmem (!%p262_p2), [#allocation3], %s652_s29 }
  0x33   : > { %s1059_s26 = scalar_lea.vmem (!%p262_p2), [#allocation4], %s653_s5  ;;  %p656_p4 = scmp.ne.s32.totalorder (!%p262_p2), %s891_s14, 0 }
  0x37   : > { %s1191_s6 = smov (!%p299_p3, %s654_s6), 63  ;;  %310 = sbr.rel (%p656_p4) target bundleno = 62 (0x3e), region = 73 }
  0x38   : > { %s655_s7 = sshll.u32 %s1191_s6, 3  ;;  %vm312_vm0 = vcmask (!%p656_p4), 7168   ;;  %v909_v16 = vmov (!%p656_p4), 0.0  }
  0x39   : > { %s1055_s20 = scalar_lea.vmem %s1170_s1, %s655_s7  ;;  %311 = vst [vmem:[%s1059_s26] sm:$0xff] (!%p656_p4), %v909_v16  ;;  %313 = vst.msk [vmem:[#allocation2] sm:$0xff] (!%p656_p4), %vm312_vm0, %v909_v16 }
  0x3e PF: > { %v350_v17 = vld [vmem:[%s1055_s20 + $0x10] sm:$0xff]  ;;  %vm479_vm1 = vcmask 7168   ;;  %v348_v18 = vld [vmem:[%s1055_s20] sm:$0xff]  ;;  %v910_v19 = vmov 0   ;;  %v349_v21 = vld [vmem:[%s1055_s20 + $0x8] sm:$0xff]  ;;  %p657_p5 = scmp.ne.s32.totalorder %s891_s14, 3 }
  0x3f   : > { %793 = vset.pattern.permute.xlu1 %v910_v19  ;;  %792 = vset.pattern.permute.xlu0 %v910_v19  ;;  %v480_v20 = vsel %vm479_vm1, %v348_v18, 0.0  ;;  %v483_v22 = vsel %vm479_vm1, %v350_v17, 0.0  ;;  %v481_v23 = vsel %vm479_vm1, %v349_v21, 0.0  ;;  %v351_v24 = vld [vmem:[%s1055_s20 + $0x18] sm:$0xff]  ;;  %v352_v28 = vld [vmem:[%s1055_s20 + $0x20] sm:$0xff]  ;;  %v353_v30 = vld [vmem:[%s1055_s20 + $0x28] sm:$0xff] }
  0x40   : > { %377 = vperm.xlu1 %793, %v350_v17   ;;  %367 = vperm.xlu0 %792, %v348_v18   ;;  %v482_v25 = vadd.f32 %v481_v23, %v480_v20  ;;  %v485_v26 = vsel %vm479_vm1, %v351_v24, 0.0  ;;  %v487_v29 = vsel %vm479_vm1, %v352_v28, 0.0  ;;  %v489_v32 = vsel %vm479_vm1, %v353_v30, 0.0  ;;  %v354_v34 = vld [vmem:[%s1055_s20 + $0x30] sm:$0xff]  ;;  %v355_v36 = vld [vmem:[%s1055_s20 + $0x38] sm:$0xff]  ;;  %v356_v40 = vld [vmem:[%s1055_s20 + $0x40] sm:$0xff] }
  0x41   : > { %v491_v35 = vsel %vm479_vm1, %v354_v34, 0.0  ;;  %v493_v38 = vsel %vm479_vm1, %v355_v36, 0.0  ;;  %v495_v41 = vsel %vm479_vm1, %v356_v40, 0.0  ;;  %v357_v42 = vld [vmem:[%s1055_s20 + $0x48] sm:$0xff]  ;;  %v358_v46 = vld [vmem:[%s1055_s20 + $0x50] sm:$0xff]  ;;  %v359_v48 = vld [vmem:[%s1055_s20 + $0x58] sm:$0xff] }
  0x42   : > { %v484_v27 = vadd.f32 %v483_v22, %v482_v25  ;;  %v497_v44 = vsel %vm479_vm1, %v357_v42, 0.0  ;;  %v499_v47 = vsel %vm479_vm1, %v358_v46, 0.0  ;;  %v501_v50 = vsel %vm479_vm1, %v359_v48, 0.0  ;;  %v360_v52 = vld [vmem:[%s1055_s20 + $0x60] sm:$0xff]  ;;  %v361_v54 = vld [vmem:[%s1055_s20 + $0x68] sm:$0xff]  ;;  %v362_v58 = vld [vmem:[%s1055_s20 + $0x70] sm:$0xff] }
  0x43   : > { %v503_v53 = vsel %vm479_vm1, %v360_v52, 0.0  ;;  %v505_v56 = vsel %vm479_vm1, %v361_v54, 0.0  ;;  %v507_v59 = vsel %vm479_vm1, %v362_v58, 0.0  ;;  %v363_v60 = vld [vmem:[%s1055_s20 + $0x78] sm:$0xff]  ;;  %v478_v0 = vld [vmem:[#allocation2] sm:$0xff]  ;;  %v664_v3 = vld [vmem:[%s1057_s24] sm:$0xff]  }
  0x44   : > { %382 = vperm.xlu1 %793, %v351_v24   ;;  %372 = vperm.xlu0 %792, %v349_v21   ;;  %v486_v31 = vadd.f32 %v485_v26, %v484_v27  ;;  %v509_v62 = vsel %vm479_vm1, %v363_v60, 0.0  ;;  %v695_v5 = vld [vmem:[%s1057_s24 + $0x8] sm:$0xff]   ;;  %v665_v7 = vunpack.c.l.bf16 %v664_v3  ;;  %v666_v8 = vunpack.c.h.bf16 %v664_v3  ;;  %v696_v12 = vld [vmem:[%s1057_s24 + $0x10] sm:$0xff]   ;;  %v697_v21 = vld [vmem:[%s1057_s24 + $0x18] sm:$0xff]  }
  0x45   : > { %v669_v9 = vunpack.c.l.bf16 %v695_v5  ;;  %v670_v14 = vunpack.c.h.bf16 %v695_v5  ;;  %v673_v18 = vunpack.c.l.bf16 %v696_v12  ;;  %v674_v24 = vunpack.c.h.bf16 %v696_v12 }
  0x46   : > { %v488_v33 = vadd.f32 %v487_v29, %v486_v31  ;;  %v677_v27 = vunpack.c.l.bf16 %v697_v21 }
  0x48   : > { %392 = vperm.xlu1 %793, %v353_v30   ;;  %387 = vperm.xlu0 %792, %v352_v28   ;;  %v490_v37 = vadd.f32 %v489_v32, %v488_v33  ;;  %v698_v30 = vld [vmem:[%s1057_s24 + $0x20] sm:$0xff]   ;;  %v678_v33 = vunpack.c.h.bf16 %v697_v21 }
  0x4a   : > { %v492_v39 = vadd.f32 %v491_v35, %v490_v37 }
  0x4c   : > { %402 = vperm.xlu1 %793, %v355_v36   ;;  %397 = vperm.xlu0 %792, %v354_v34   ;;  %v494_v43 = vadd.f32 %v493_v38, %v492_v39  ;;  %v681_v36 = vunpack.c.l.bf16 %v698_v30  ;;  %v699_v39 = vld [vmem:[%s1057_s24 + $0x28] sm:$0xff]  }
  0x4e   : > { %v496_v45 = vadd.f32 %v495_v41, %v494_v43 }
  0x50   : > { %412 = vperm.xlu1 %793, %v357_v42   ;;  %407 = vperm.xlu0 %792, %v356_v40   ;;  %v498_v49 = vadd.f32 %v497_v44, %v496_v45  ;;  %v682_v42 = vunpack.c.h.bf16 %v698_v30  ;;  %v685_v45 = vunpack.c.l.bf16 %v699_v39 }
  0x52   : > { %v500_v51 = vadd.f32 %v499_v47, %v498_v49 }
  0x54   : > { %422 = vperm.xlu1 %793, %v359_v48   ;;  %417 = vperm.xlu0 %792, %v358_v46   ;;  %v502_v55 = vadd.f32 %v501_v50, %v500_v51  ;;  %v700_v48 = vld [vmem:[%s1057_s24 + $0x30] sm:$0xff]   ;;  %v686_v51 = vunpack.c.h.bf16 %v699_v39 }
  0x56   : > { %v504_v57 = vadd.f32 %v503_v53, %v502_v55 }
  0x58   : > { %432 = vperm.xlu1 %793, %v361_v54   ;;  %427 = vperm.xlu0 %792, %v360_v52   ;;  %v506_v61 = vadd.f32 %v505_v56, %v504_v57  ;;  %v689_v54 = vunpack.c.l.bf16 %v700_v48  ;;  %v701_v57 = vld [vmem:[%s1057_s24 + $0x38] sm:$0xff]  }
  0x59   : > { %v694_v3 = vunpack.c.h.bf16 %v701_v57 }
  0x5a   : > { %v508_v63 = vadd.f32 %v507_v59, %v506_v61 }
  0x5c   : > { %442 = vperm.xlu1 %793, %v363_v60   ;;  %437 = vperm.xlu0 %792, %v362_v58   ;;  %v510_v1 = vadd.f32 %v509_v62, %v508_v63  ;;  %v690_v60 = vunpack.c.h.bf16 %v700_v48  ;;  %v693_v63 = vunpack.c.l.bf16 %v701_v57 }
  0x5e   : > { %v511_v2 = vadd.f32 %v510_v1, %v478_v0 }
  0x60   : > { %512 = vst.msk [vmem:[#allocation2] sm:$0xff] %vm479_vm1, %v511_v2 }
  0x67   : > { %v518_v12 = vld [vmem:[#allocation2] sm:$0xff] (!%p657_p5) }
  0x68   : > { %795 = vrcp.f32 (!%p657_p5), %v518_v12 }
  0xbf   : > { %v378_v4 = vpop.permute.xlu1 %377  ;;  %v368_v6 = vpop.permute.xlu0 %367 }
  0xc0   : > { %v445_v13 = vmul.f32 %v665_v7, %v368_v6  ;;  %v447_v16 = vmul.f32 %v669_v9, %v378_v4  ;;  %v364_v9 = vld [vmem:[%s1059_s26] sm:$0xff] }
  0xc3   : > { %v383_v10 = vpop.permute.xlu1 %382  ;;  %v373_v11 = vpop.permute.xlu0 %372 }
  0xc4   : > { %v446_v15 = vmul.f32 %v666_v8, %v373_v11  ;;  %v448_v22 = vmul.f32 %v670_v14, %v383_v10  ;;  %v796_v14 = vpop.eup (!%p657_p5), %795 }
  0xc6   : > { %v461_v17 = vadd.f32 %v446_v15, %v445_v13  ;;  %v911_v13 = vmov (!%p657_p5), 0  }
  0xc7   : > { %v393_v19 = vpop.permute.xlu1 %392  ;;  %v388_v20 = vpop.permute.xlu0 %387  ;;  %794 = vset.pattern.permute.xlu0 (!%p657_p5), %v911_v13 }
  0xc8   : > { %v462_v23 = vadd.f32 %v461_v17, %v447_v16  ;;  %v449_v25 = vmul.f32 %v673_v18, %v388_v20  ;;  %v450_v31 = vmul.f32 %v674_v24, %v393_v19  ;;  %522 = vperm.xlu0 (!%p657_p5), %794, %v796_v14  }
  0xca   : > { %v463_v26 = vadd.f32 %v462_v23, %v448_v22 }
  0xcb   : > { %v403_v28 = vpop.permute.xlu1 %402  ;;  %v398_v29 = vpop.permute.xlu0 %397 }
  0xcc   : > { %v464_v32 = vadd.f32 %v463_v26, %v449_v25  ;;  %v451_v34 = vmul.f32 %v677_v27, %v398_v29  ;;  %v452_v40 = vmul.f32 %v678_v33, %v403_v28 }
  0xce   : > { %v465_v35 = vadd.f32 %v464_v32, %v450_v31 }
  0xcf   : > { %v413_v37 = vpop.permute.xlu1 %412  ;;  %v408_v38 = vpop.permute.xlu0 %407 }
  0xd0   : > { %v466_v41 = vadd.f32 %v465_v35, %v451_v34  ;;  %v453_v43 = vmul.f32 %v681_v36, %v408_v38  ;;  %v454_v49 = vmul.f32 %v682_v42, %v413_v37 }
  0xd2   : > { %v467_v44 = vadd.f32 %v466_v41, %v452_v40 }
  0xd3   : > { %v423_v46 = vpop.permute.xlu1 %422  ;;  %v418_v47 = vpop.permute.xlu0 %417 }
  0xd4   : > { %v468_v50 = vadd.f32 %v467_v44, %v453_v43  ;;  %v455_v52 = vmul.f32 %v685_v45, %v418_v47  ;;  %v456_v58 = vmul.f32 %v686_v51, %v423_v46 }
  0xd6   : > { %v469_v53 = vadd.f32 %v468_v50, %v454_v49 }
  0xd7   : > { %v433_v55 = vpop.permute.xlu1 %432  ;;  %v428_v56 = vpop.permute.xlu0 %427 }
  0xd8   : > { %v470_v59 = vadd.f32 %v469_v53, %v455_v52  ;;  %v457_v61 = vmul.f32 %v689_v54, %v428_v56  ;;  %v458_v1 = vmul.f32 %v690_v60, %v433_v55 }
  0xda   : > { %v471_v62 = vadd.f32 %v470_v59, %v456_v58 }
  0xdb   : > { %v438_v0 = vpop.permute.xlu0 %437  ;;  %v443_v4 = vpop.permute.xlu1 %442 }
  0xdc   : > { %v472_v2 = vadd.f32 %v471_v62, %v457_v61  ;;  %v459_v5 = vmul.f32 %v693_v63, %v438_v0  ;;  %v460_v7 = vmul.f32 %v694_v3, %v443_v4 }
  0xde   : > { %v473_v6 = vadd.f32 %v472_v2, %v458_v1 }
  0xe0   : > { %v474_v8 = vadd.f32 %v473_v6, %v459_v5  ;;  %516 = sbr.rel (%p657_p5) target bundleno = 331 (0x14b), region = 77 }
  0xe2   : > { %v475_v10 = vadd.f32 %v474_v8, %v460_v7 }
  0xe4   : > { %v476_v11 = vadd.f32 %v475_v10, %v364_v9 }
  0xe6   : > { %477 = vst [vmem:[%s1059_s26] sm:$0xff] %v476_v11 }
  0xed   : > { %v517_v15 = vld [vmem:[%s1059_s26] sm:$0xff] }
 0x147   : > { %v523_v16 = vpop.permute.xlu0 %522 }
 0x148   : > { %v525_v17 = vmul.f32 %v523_v16, %v517_v15 }
 0x14a   : > { %526 = vst [vmem:[%s1059_s26] sm:$0xff] %v525_v17 }
 0x14b PF: > { %s659_s12 = sshll.u32 %s895_s15, 7  ;;  %s543_s29 = sshll.u32 %s1059_s26, 4  ;;  %s544_s29 = int_to_ptr.vmem [resolvable:$true] %s543_s29 }
 0x14c   : > { %s1113_s25 = scalar_lea.hbm %s1171_s2, %s659_s12  ;;  %s528_s5 = scalar_lea.sflag [#allocation5], %s294_s28 }
 0x14d   : > { %s797_s6 = scalar_lea.vmem %s544_s29, 128  ;;  %s912_s7 = smov [#allocation4]  }
 0x14e   : > { %p798_p6 = scmp.ne.s32.totalorder %s544_s29, %s797_s6  ;;  %s801_s8 = sshll.u32 %s912_s7, 4  ;;  %s802_s8 = int_to_ptr.vmem [resolvable:$false] %s801_s8 }
 0x14f   : > { %s803_s19 = scalar_lea.vmem %s802_s8, 256  ;;  %p804_p10 = scmp.lt.s32.totalorder %s544_s29, %s802_s8 }
 0x150   : > { %p799_p8 = pnand %p798_p6, %p1000_p7  ;;  %p805_p11 = scmp.lt.s32.totalorder %s803_s19, %s797_s6 }
 0x152   : > { %p800_p9 = pneg %p799_p8  ;;  %p806_p13 = por %p805_p11, %p804_p10 }
 0x154   : > { %p807_p0 = pnand %p806_p13, %p800_p9 }
 0x156   : > { %810 = shalt.err (!%p807_p0)
}
 0x157   : > { %s811_s15 = scalar_lea.hbm %s1113_s25, 128  ;;  %s815_s24 = scalar_lea.hbm %s1171_s2, 256 }
 0x158   : > { %p812_p1 = scmp.ne.s32.totalorder %s1113_s25, %s811_s15  ;;  %p816_p4 = scmp.lt.u32.totalorder %s1113_s25, %s1171_s2 }
 0x159   : > { %p817_p5 = scmp.lt.u32.totalorder %s815_s24, %s811_s15  ;;  %p819_p8 = scmp.lt.u32.totalorder %s811_s15, %s1113_s25 }
 0x15a   : > { %p813_p2 = pnand %p812_p1, %p1000_p7 }
 0x15b   : > { %p818_p6 = por %p817_p5, %p816_p4 }
 0x15c   : > { %p814_p3 = pneg %p813_p2 }
 0x15d   : > { %p820_p9 = por %p819_p8, %p818_p6 }
 0x15f   : > { %p821_p10 = pnand %p820_p9, %p814_p3 }
 0x161   : > { %824 = shalt.err (!%p821_p10)
}
 0x162   : > { %702 = dma.vmem_to_hbm [thread:$0]  (%p1000_p7), %s544_s29, 128, %s1113_s25, %s528_s5  }
 0x163 PF: > { %p708_p11 = scmp.ge.s32.totalorder %s907_s18, 2  ;;  %s555_s14 = sand.u32 1, %s871_s9  }
 0x164   : > { %s556_s23 = scalar_lea.sflag [#allocation5], %s555_s14 }
 0x165   : > { %p705_p13 = pnand %p708_p11, %p1008_p12 }
 0x167   : > { %866 = dma.done.wait (!%p705_p13), %s556_s23, 128  }
 0x168   : > { %868 = vsyncadd (!%p705_p13), %s556_s23, 4294967168  ;;  %s15_s18 = sadd.s32 1, %s907_s18   ;;  %s1175_s9 = smov %s875_s10 }
 0x169   : > { %p12_p0 = scmp.ge.s32.totalorder %s15_s18, 10   ;;  %s1176_s10 = smov %s879_s11 }
 0x16a   : > { %s1177_s11 = smov %s1013_s3  ;;  %s1178_s12 = smov %s887_s13 }
 0x16b   : > { %s1179_s13 = smov %s1016_s4  ;;  %s1180_s14 = smov %s899_s16 }
 0x16c   : > { %s1181_s15 = smov %s903_s17  ;;  %s1182_s16 = smov %s1185_s21 }
 0x16d   : > { %s1183_s17 = smov %s1189_s22  ;;  %14 = sbr.rel (!%p12_p0) target bundleno = 6 (0x6), region = 121 }
 0x174   :  { %561 = vsyncpa [#allocation5], 1 }
 0x175   :  { %563 = vsyncpa [#allocation5 + $0x1], 1 }

</bundles_post_ra>
